<compile_context>
chip_gen: v7x
topology: tpu7x:2x2x1
jax: 0.10.0
libtpu: 0.0.40
codegen_flags: <defaults>
</compile_context>

<pallas_src>
import numpy as np
import jax
import jax.numpy as jnp
from jax import lax
from jax.experimental import pallas as pl
from jax.experimental.pallas import tpu as pltpu


# ----------------------------------------------------------------------------
# In-kernel stateless PRNG helpers (plain jnp/lax ops only).
# ----------------------------------------------------------------------------
def _wrap_i32(c):
    """Python int -> equivalent int32 two's-complement value."""
    c &= 0xFFFFFFFF
    return c - (1 << 32) if c >= (1 << 31) else c


_M1 = _wrap_i32(0x7FEB352D)      # lowbias32 hash constants
_M2 = _wrap_i32(0x846CA68B)
_GOLDEN = _wrap_i32(0x9E3779B9)

# Giles (2010) single-precision erfinv polynomial coefficients.
_C_CENTRAL = (2.81022636e-08, 3.43273939e-07, -3.5233877e-06, -4.39150654e-06,
              0.00021858087, -0.00125372503, -0.00417768164, 0.246640727,
              1.50140941)
_C_TAIL = (-0.000200214257, 0.000100950558, 0.00134934322, -0.00367342844,
           0.00573950773, -0.0076224613, 0.00943887047, 1.00167406,
           2.83297682)
_SQRT2 = 1.4142135623730951


def _shr(x, k):
    """Logical right shift on int32 arrays."""
    return lax.shift_right_logical(x, jnp.full(x.shape, k, x.dtype))


def _hash_i32(x):
    """lowbias32 integer hash (good avalanche for sequential counters)."""
    x = x ^ _shr(x, 16)
    x = x * _M1
    x = x ^ _shr(x, 15)
    x = x * _M2
    x = x ^ _shr(x, 16)
    return x


def _poly(w, coeffs):
    p = jnp.full_like(w, coeffs[0])
    for c in coeffs[1:]:
        p = p * w + c
    return p


# ----------------------------------------------------------------------------
# Kernel
# ----------------------------------------------------------------------------
def _add_gaussian_noise_kernel(seed_ref, params_ref, x_ref, o_ref):
    # seed_ref:   (1,) int32   SMEM  -- base seed for this call
    # params_ref: (2,) float32 SMEM  -- [std, mean]
    # x_ref/o_ref: (tile_rows, L) VMEM tiles
    tile = pl.program_id(0)
    rows, lanes = x_ref.shape
    std = params_ref[0]
    mean = params_ref[1]

    # Global flat element index: noise depends only on (seed, element position),
    # independent of the tiling choice -> no per-tile seed-correlation issue.
    row_ids = lax.broadcasted_iota(jnp.int32, (rows, lanes), 0)
    col_ids = lax.broadcasted_iota(jnp.int32, (rows, lanes), 1)
    idx = tile * (rows * lanes) + row_ids * lanes + col_ids

    # Counter-based PRNG: seed-keyed integer hash of the element index.
    key = seed_ref[0] * _GOLDEN
    bits = _hash_i32(idx ^ key)

    # Top 24 bits -> uniform in the open interval (0, 1).
    u = (_shr(bits, 8).astype(jnp.float32) + 0.5) * (1.0 / 16777216.0)

    # Standard normal via  z = sqrt(2) * erfinv(2u - 1)   (Giles 2010 polys).
    a = 2.0 * u - 1.0
    w = -jnp.log((1.0 - a) * (1.0 + a))
    p_central = _poly(w - 2.5, _C_CENTRAL)
    p_tail = _poly(jnp.sqrt(w) - 3.0, _C_TAIL)
    normal = _SQRT2 * (jnp.where(w < 5.0, p_central, p_tail) * a)

    x = x_ref[...].astype(jnp.float32)
    o_ref[...] = (x + normal * std + mean).astype(o_ref.dtype)


# ----------------------------------------------------------------------------
# Wrapper
# ----------------------------------------------------------------------------
def add_gaussian_noise(x, *, std, mean, seed, target_tile_bytes=2 * 1024 * 1024):
    """y = x + N(mean, std^2) element-wise noise via a Pallas TPU kernel."""
    if not jnp.issubdtype(x.dtype, jnp.floating):
        raise TypeError(f"add_gaussian_noise expects a floating dtype, got {x.dtype}")

    orig_shape = x.shape
    total = int(x.size)
    itemsize = jnp.dtype(x.dtype).itemsize

    # --- pick a lane-dense 2-D factorization total = rows * lane (lane % 128 == 0)
    lane = None
    for cand in (1024, 512, 256, 128):          # prefer shapes with >= 16 rows
        if total % cand == 0 and total // cand >= 16:
            lane = cand
            break
    if lane is None:
        for cand in (1024, 512, 256, 128):
            if total % cand == 0:
                lane = cand
                break

    padded_total = total
    if lane is None:
        # Fallback only when x.size is not a multiple of 128: pad to one extra
        # 128-lane row (this copies the tensor once).
        # TODO(synk): handle the <128-element tail with an in-kernel masked
        # store instead of jnp.pad to avoid the extra HBM pass.
        lane = 128
        padded_total = -(-total // lane) * lane
    rows = padded_total // lane

    # --- pick tile_rows: ~target_tile_bytes tiles, multiple of 8, and at least
    # 2 grid steps whenever there is more than one 8-row chunk (v7x: lets the
    # "parallel" axis be split across both TensorCores).
    if rows <= 8:
        tile_rows = rows                         # full-extent block (always legal)
    else:
        tile_rows = max(8, (target_tile_bytes // (lane * itemsize)) // 8 * 8)
        tile_rows = min(tile_rows, max(8, (rows // 2) // 8 * 8))
    grid = (pl.cdiv(rows, tile_rows),)           # ragged last tile allowed

    flat = x.reshape(-1)                         # free (metadata only)
    if padded_total != total:
        flat = jnp.pad(flat, (0, padded_total - total))
    x2d = flat.reshape(rows, lane)

    seed_arr = jnp.asarray([seed], dtype=jnp.int32)
    params = jnp.asarray([std, mean], dtype=jnp.float32)

    cost = pl.CostEstimate(
        flops=60 * padded_total,                 # hash + erfinv + fused add
        transcendentals=2 * padded_total,        # log + sqrt per element
        bytes_accessed=2 * padded_total * itemsize,
    )

    out2d = pl.pallas_call(
        _add_gaussian_noise_kernel,
        out_shape=jax.ShapeDtypeStruct((rows, lane), x.dtype),
        grid=grid,
        in_specs=[
            pl.BlockSpec(memory_space=pltpu.MemorySpace.SMEM),   # seed
            pl.BlockSpec(memory_space=pltpu.MemorySpace.SMEM),   # [std, mean]
            pl.BlockSpec((tile_rows, lane), lambda i: (i, 0)),   # x tile
        ],
        out_specs=pl.BlockSpec((tile_rows, lane), lambda i: (i, 0)),
        input_output_aliases={2: 0},             # reuse x2d's HBM buffer when donated
        compiler_params=pltpu.CompilerParams(
            dimension_semantics=("parallel",),   # shard rows across TCs on v7x
            vmem_limit_bytes=32 * 1024 * 1024,
        ),
        cost_estimate=cost,
    )(seed_arr, params, x2d)

    out = out2d.reshape(-1)
    if padded_total != total:
        out = out[:total]
    return out.reshape(orig_shape)


class AddGaussianNoise:
    """Applies random Gaussian noise to a tensor (noise generated in-kernel).

    Matches the PyTorch module: the per-call noise std is drawn host-side from
    Uniform(0, std); the per-element normals come from an in-kernel stateless
    PRNG (same distribution as torch.randn_like, different RNG stream).
    """

    def __init__(self, mean=0.0, std=0.1, seed=None):
        self.mean = float(mean)
        self.std = float(std)
        self.rng = np.random.default_rng(seed)

    def __call__(self, x):
        # Host-side Python-level draw, exactly like the PyTorch forward.
        std = float(self.rng.uniform(0.0, self.std))
        seed = int(self.rng.integers(0, 2**31 - 1))  # per-call kernel PRNG seed
        return add_gaussian_noise(x, std=std, mean=self.mean, seed=seed)


if __name__ == "__main__":
    key = jax.random.PRNGKey(0)
    N, C, H, W = 2, 4, 16, 16
    x = jax.random.normal(key, (N, C, H, W), dtype=jnp.float32)

    # 1) Deterministic check: std == 0 -> noise collapses to the constant mean.
    y_det = jax.block_until_ready(add_gaussian_noise(x, std=0.0, mean=0.5, seed=123))
    np.testing.assert_allclose(np.asarray(y_det), np.asarray(x) + 0.5,
                               rtol=1e-6, atol=1e-6)

    # 2) Statistical check with a fixed std: noise ~ N(0, 0.1^2) over 2048 elems.
    y_fix = jax.block_until_ready(add_gaussian_noise(x, std=0.1, mean=0.0, seed=7))
    noise = np.asarray(y_fix) - np.asarray(x)
    assert abs(float(noise.mean())) < 0.02, noise.mean()
    assert abs(float(noise.std()) - 0.1) < 0.03, noise.std()

    # 3) Non-128-divisible size: exercises the pad fallback + ragged last tile.
    x_odd = jax.random.normal(jax.random.PRNGKey(1), (3, 5, 24, 4), dtype=jnp.float32)
    y_odd = jax.block_until_ready(add_gaussian_noise(x_odd, std=0.0, mean=-1.0, seed=3))
    np.testing.assert_allclose(np.asarray(y_odd), np.asarray(x_odd) - 1.0,
                               rtol=1e-6, atol=1e-6)

    # 4) Full module semantics (host-side uniform draw of std, then noisy add).
    m = AddGaussianNoise(mean=0.0, std=0.1, seed=0)
    y = jax.block_until_ready(m(x))
    assert y.shape == x.shape and y.dtype == x.dtype
    assert np.isfinite(np.asarray(y)).all()
    assert float(np.abs(np.asarray(y) - np.asarray(x)).mean()) < 0.5

    print("KERNEL_OK")
</pallas_src>

<mosaic_0001>
module attributes {stable_mosaic.version = 11 : i64} {
  func.func @_add_gaussian_noise_kernel(%arg0: i32, %arg1: memref<1xi32, #tpu.memory_space<smem>>, %arg2: memref<2xf32, #tpu.memory_space<smem>>, %arg3: memref<8x128xf32, #tpu.memory_space<vmem>>, %arg4: memref<8x128xf32, #tpu.memory_space<vmem>>) attributes {dimension_semantics = [#tpu.dimension_semantics<parallel>], iteration_bounds = array<i64: 2>, scalar_prefetch = 0 : i64, scratch_operands = 0 : i64, tpu.core_type = #tpu.core_type<tc>, window_params = [{transform_indices = @transform_0, window_bounds = array<i64: 1>}, {transform_indices = @transform_1, window_bounds = array<i64: 2>}, {transform_indices = @transform_2, window_bounds = array<i64: 8, 128>}, {transform_indices = @transform_3, window_bounds = array<i64: 8, 128>}]} {
    %c0 = arith.constant 0 : index
    %0 = memref.load %arg2[%c0] : memref<2xf32, #tpu.memory_space<smem>>
    %c1 = arith.constant 1 : index
    %1 = memref.load %arg2[%c1] : memref<2xf32, #tpu.memory_space<smem>>
    %2 = tpu.iota {dimensions = array<i32: 0>} : vector<8x128xi32>
    %3 = tpu.iota {dimensions = array<i32: 1>} : vector<8x128xi32>
    %c1024_i32 = arith.constant 1024 : i32
    %4 = arith.muli %arg0, %c1024_i32 : i32
    %c128_i32 = arith.constant 128 : i32
    %5 = vector.broadcast %c128_i32 : i32 to vector<8x128xi32>
    %6 = arith.muli %2, %5 : vector<8x128xi32>
    %7 = vector.broadcast %4 : i32 to vector<8x128xi32>
    %8 = arith.addi %7, %6 : vector<8x128xi32>
    %9 = arith.addi %8, %3 : vector<8x128xi32>
    %c0_0 = arith.constant 0 : index
    %10 = memref.load %arg1[%c0_0] : memref<1xi32, #tpu.memory_space<smem>>
    %c-1640531527_i32 = arith.constant -1640531527 : i32
    %11 = arith.muli %10, %c-1640531527_i32 : i32
    %12 = vector.broadcast %11 : i32 to vector<8x128xi32>
    %13 = arith.xori %9, %12 : vector<8x128xi32>
    %c16_i32 = arith.constant 16 : i32
    %14 = vector.broadcast %c16_i32 : i32 to vector<8x128xi32>
    %15 = arith.shrui %13, %14 : vector<8x128xi32>
    %16 = arith.xori %13, %15 : vector<8x128xi32>
    %c2146121005_i32 = arith.constant 2146121005 : i32
    %17 = vector.broadcast %c2146121005_i32 : i32 to vector<8x128xi32>
    %18 = arith.muli %16, %17 : vector<8x128xi32>
    %c15_i32 = arith.constant 15 : i32
    %19 = vector.broadcast %c15_i32 : i32 to vector<8x128xi32>
    %20 = arith.shrui %18, %19 : vector<8x128xi32>
    %21 = arith.xori %18, %20 : vector<8x128xi32>
    %c-2073254261_i32 = arith.constant -2073254261 : i32
    %22 = vector.broadcast %c-2073254261_i32 : i32 to vector<8x128xi32>
    %23 = arith.muli %21, %22 : vector<8x128xi32>
    %c16_i32_1 = arith.constant 16 : i32
    %24 = vector.broadcast %c16_i32_1 : i32 to vector<8x128xi32>
    %25 = arith.shrui %23, %24 : vector<8x128xi32>
    %26 = arith.xori %23, %25 : vector<8x128xi32>
    %c8_i32 = arith.constant 8 : i32
    %27 = vector.broadcast %c8_i32 : i32 to vector<8x128xi32>
    %28 = arith.shrui %26, %27 : vector<8x128xi32>
    %29 = arith.sitofp %28 : vector<8x128xi32> to vector<8x128xf32>
    %cst = arith.constant 5.000000e-01 : f32
    %30 = vector.broadcast %cst : f32 to vector<8x128xf32>
    %31 = arith.addf %29, %30 : vector<8x128xf32>
    %cst_2 = arith.constant 5.96046448E-8 : f32
    %32 = vector.broadcast %cst_2 : f32 to vector<8x128xf32>
    %33 = arith.mulf %31, %32 : vector<8x128xf32>
    %cst_3 = arith.constant 2.000000e+00 : f32
    %34 = vector.broadcast %cst_3 : f32 to vector<8x128xf32>
    %35 = arith.mulf %34, %33 : vector<8x128xf32>
    %cst_4 = arith.constant 1.000000e+00 : f32
    %36 = vector.broadcast %cst_4 : f32 to vector<8x128xf32>
    %37 = arith.subf %35, %36 : vector<8x128xf32>
    %cst_5 = arith.constant 1.000000e+00 : f32
    %38 = vector.broadcast %cst_5 : f32 to vector<8x128xf32>
    %39 = arith.subf %38, %37 : vector<8x128xf32>
    %cst_6 = arith.constant 1.000000e+00 : f32
    %40 = vector.broadcast %cst_6 : f32 to vector<8x128xf32>
    %41 = arith.addf %40, %37 : vector<8x128xf32>
    %42 = arith.mulf %39, %41 : vector<8x128xf32>
    %43 = math.log %42 : vector<8x128xf32>
    %cst_7 = arith.constant 0.000000e+00 : f32
    %44 = vector.broadcast %cst_7 : f32 to vector<8x128xf32>
    %45 = arith.subf %44, %43 : vector<8x128xf32>
    %cst_8 = arith.constant 2.500000e+00 : f32
    %46 = vector.broadcast %cst_8 : f32 to vector<8x128xf32>
    %47 = arith.subf %45, %46 : vector<8x128xf32>
    %cst_9 = arith.constant 2.81022636E-8 : f32
    %48 = vector.broadcast %cst_9 : f32 to vector<8x128xf32>
    %49 = arith.mulf %48, %47 : vector<8x128xf32>
    %cst_10 = arith.constant 3.43273939E-7 : f32
    %50 = vector.broadcast %cst_10 : f32 to vector<8x128xf32>
    %51 = arith.addf %49, %50 : vector<8x128xf32>
    %52 = arith.mulf %51, %47 : vector<8x128xf32>
    %cst_11 = arith.constant -3.5233877E-6 : f32
    %53 = vector.broadcast %cst_11 : f32 to vector<8x128xf32>
    %54 = arith.addf %52, %53 : vector<8x128xf32>
    %55 = arith.mulf %54, %47 : vector<8x128xf32>
    %cst_12 = arith.constant -4.39150654E-6 : f32
    %56 = vector.broadcast %cst_12 : f32 to vector<8x128xf32>
    %57 = arith.addf %55, %56 : vector<8x128xf32>
    %58 = arith.mulf %57, %47 : vector<8x128xf32>
    %cst_13 = arith.constant 2.1858087E-4 : f32
    %59 = vector.broadcast %cst_13 : f32 to vector<8x128xf32>
    %60 = arith.addf %58, %59 : vector<8x128xf32>
    %61 = arith.mulf %60, %47 : vector<8x128xf32>
    %cst_14 = arith.constant -0.00125372503 : f32
    %62 = vector.broadcast %cst_14 : f32 to vector<8x128xf32>
    %63 = arith.addf %61, %62 : vector<8x128xf32>
    %64 = arith.mulf %63, %47 : vector<8x128xf32>
    %cst_15 = arith.constant -0.00417768164 : f32
    %65 = vector.broadcast %cst_15 : f32 to vector<8x128xf32>
    %66 = arith.addf %64, %65 : vector<8x128xf32>
    %67 = arith.mulf %66, %47 : vector<8x128xf32>
    %cst_16 = arith.constant 0.246640727 : f32
    %68 = vector.broadcast %cst_16 : f32 to vector<8x128xf32>
    %69 = arith.addf %67, %68 : vector<8x128xf32>
    %70 = arith.mulf %69, %47 : vector<8x128xf32>
    %cst_17 = arith.constant 1.50140941 : f32
    %71 = vector.broadcast %cst_17 : f32 to vector<8x128xf32>
    %72 = arith.addf %70, %71 : vector<8x128xf32>
    %73 = math.sqrt %45 : vector<8x128xf32>
    %cst_18 = arith.constant 3.000000e+00 : f32
    %74 = vector.broadcast %cst_18 : f32 to vector<8x128xf32>
    %75 = arith.subf %73, %74 : vector<8x128xf32>
    %cst_19 = arith.constant -2.00214257E-4 : f32
    %76 = vector.broadcast %cst_19 : f32 to vector<8x128xf32>
    %77 = arith.mulf %76, %75 : vector<8x128xf32>
    %cst_20 = arith.constant 1.00950558E-4 : f32
    %78 = vector.broadcast %cst_20 : f32 to vector<8x128xf32>
    %79 = arith.addf %77, %78 : vector<8x128xf32>
    %80 = arith.mulf %79, %75 : vector<8x128xf32>
    %cst_21 = arith.constant 0.00134934322 : f32
    %81 = vector.broadcast %cst_21 : f32 to vector<8x128xf32>
    %82 = arith.addf %80, %81 : vector<8x128xf32>
    %83 = arith.mulf %82, %75 : vector<8x128xf32>
    %cst_22 = arith.constant -0.00367342844 : f32
    %84 = vector.broadcast %cst_22 : f32 to vector<8x128xf32>
    %85 = arith.addf %83, %84 : vector<8x128xf32>
    %86 = arith.mulf %85, %75 : vector<8x128xf32>
    %cst_23 = arith.constant 0.00573950773 : f32
    %87 = vector.broadcast %cst_23 : f32 to vector<8x128xf32>
    %88 = arith.addf %86, %87 : vector<8x128xf32>
    %89 = arith.mulf %88, %75 : vector<8x128xf32>
    %cst_24 = arith.constant -0.0076224613 : f32
    %90 = vector.broadcast %cst_24 : f32 to vector<8x128xf32>
    %91 = arith.addf %89, %90 : vector<8x128xf32>
    %92 = arith.mulf %91, %75 : vector<8x128xf32>
    %cst_25 = arith.constant 0.00943887047 : f32
    %93 = vector.broadcast %cst_25 : f32 to vector<8x128xf32>
    %94 = arith.addf %92, %93 : vector<8x128xf32>
    %95 = arith.mulf %94, %75 : vector<8x128xf32>
    %cst_26 = arith.constant 1.00167406 : f32
    %96 = vector.broadcast %cst_26 : f32 to vector<8x128xf32>
    %97 = arith.addf %95, %96 : vector<8x128xf32>
    %98 = arith.mulf %97, %75 : vector<8x128xf32>
    %cst_27 = arith.constant 2.83297682 : f32
    %99 = vector.broadcast %cst_27 : f32 to vector<8x128xf32>
    %100 = arith.addf %98, %99 : vector<8x128xf32>
    %cst_28 = arith.constant 5.000000e+00 : f32
    %101 = vector.broadcast %cst_28 : f32 to vector<8x128xf32>
    %102 = arith.cmpf olt, %45, %101 : vector<8x128xf32>
    %103 = arith.select %102, %72, %100 : vector<8x128xi1>, vector<8x128xf32>
    %104 = arith.mulf %103, %37 : vector<8x128xf32>
    %cst_29 = arith.constant 1.41421354 : f32
    %105 = vector.broadcast %cst_29 : f32 to vector<8x128xf32>
    %106 = arith.mulf %105, %104 : vector<8x128xf32>
    %c0_30 = arith.constant 0 : index
    %c0_31 = arith.constant 0 : index
    %107 = vector.load %arg3[%c0_30, %c0_31] : memref<8x128xf32, #tpu.memory_space<vmem>>, vector<8x128xf32>
    %108 = vector.broadcast %0 : f32 to vector<8x128xf32>
    %109 = arith.mulf %106, %108 : vector<8x128xf32>
    %110 = arith.addf %107, %109 : vector<8x128xf32>
    %111 = vector.broadcast %1 : f32 to vector<8x128xf32>
    %112 = arith.addf %110, %111 : vector<8x128xf32>
    %c0_32 = arith.constant 0 : index
    %c0_33 = arith.constant 0 : index
    %113 = vector.load %arg4[%c0_32, %c0_33] : memref<8x128xf32, #tpu.memory_space<vmem>>, vector<8x128xf32>
    tpu.vector_store %arg4[%c0_32, %c0_33], %112 {strides = array<i32>} : memref<8x128xf32, #tpu.memory_space<vmem>>, vector<8x128xf32>,
    return
  }
  func.func @transform_0(%arg0: i32) -> i32 {
    %c0_i32 = arith.constant 0 : i32
    %c0_i32_0 = arith.constant 0 : i32
    return %c0_i32 : i32
  }
  func.func @transform_1(%arg0: i32) -> i32 {
    %c0_i32 = arith.constant 0 : i32
    %c0_i32_0 = arith.constant 0 : i32
    return %c0_i32 : i32
  }
  func.func @transform_2(%arg0: i32) -> (i32, i32) {
    %c0_i32 = arith.constant 0 : i32
    %c0_i32_0 = arith.constant 0 : i32
    return %arg0, %c0_i32 : i32, i32
  }
  func.func @transform_3(%arg0: i32) -> (i32, i32) {
    %c0_i32 = arith.constant 0 : i32
    %c0_i32_0 = arith.constant 0 : i32
    return %arg0, %c0_i32 : i32, i32
  }
}

</mosaic_0001>

<bundles_post_ra>
// kernel: tpu_custom_call.1
= control target key start
LH: loop header
LB: loop body
LE: loop exit
PB: predicated region body
PF: predicated region fallthrough
CT: control target
= control target key end

     0   :  { %s807_s0 = inlined_call_operand.<no memory space> [shape: s32[1], index: 0, kind: input, shape index: {}]   ;;  %s808_s1 = inlined_call_operand.vmem [shape: f32[2], index: 1, kind: input, shape index: {}]   ;;  %s809_s2 = inlined_call_operand.hbm [shape: f32[16,128], index: 2, kind: input, shape index: {}, may-alias: {2,3}]   ;;  %s810_s3 = inlined_call_operand.hbm [shape: f32[16,128], index: 3, kind: output, shape index: {}, may-alias: {2,3}]  }
   0x1   :  { %8 = sst [smem:[#allocation2]] %s807_s0 }
   0x2   :  { %9 = vsyncpa [#allocation6], 0 }
   0x3   :  { %10 = vsyncpa [#allocation4], 0 }
   0x4   :  { %12 = vsyncpa [#allocation4 + $0x1], 0 }
   0x5   :  { %13 = vsyncpa [#allocation5], 0 }
   0x6   :  { %15 = vsyncpa [#allocation5 + $0x1], 0  ;;  %s607_s14 = smov 0   ;;  %s609_s15 = smov 0  }
   0x7   :  { %s611_s16 = smov 0   ;;  %s613_s17 = smov 0  }
   0x8 LB: > { %s628_s0 = sadd.s32 4294967295, %s579_s17   ;;  %s384_s18 = sadd.s32 4294967294, %s579_s17   ;;  %s579_s17 = sphi %s613_s17, %s831_s17   ;;  %s575_s16 = sphi %s611_s16, %s830_s16   ;;  %s571_s15 = sphi %s609_s15, %s829_s15   ;;  %s567_s14 = sphi %s607_s14, %s828_s14  }
   0x9   : > { %p83_p0 = scmp.ne.s32.totalorder %s571_s15, %s567_s14  ;;  %p811_p1 = scmp.eq.s32.totalorder %s628_s0, 0 }
   0xa   : > { %p113_p3 = scmp.eq.s32.totalorder %s384_s18, 1  ;;  %p385_p5 = scmp.ge.s32.totalorder %s579_s17, 1 }
   0xb   : > { %p637_p4 = por %p811_p1, %p83_p0  ;;  %p120_p7 = scmp.lt.s32.totalorder %s579_s17, 3 }
   0xc   : > { %p642_p6 = por %p113_p3, %p83_p0  ;;  %s136_s23 = sshll.u32 %s808_s1, 4  ;;  %s137_s23 = int_to_ptr.vmem [resolvable:$true] %s136_s23 }
   0xd   : > { %s814_s19 = scalar_select %p637_p4, 1, 0 }
   0xe   : > { %s815_s20 = scalar_select %p642_p6, 1, 0 }
   0xf   : > { %p650_p8 = pnand %p385_p5, %p120_p7  ;;  %s658_s25 = sadd.s32 1, %s579_s17  }
  0x10   : > { %s67_s27 = ssub.s32 %s579_s17, %s658_s25  ;;  %s70_s29 = sadd.s32 1, %s575_s16 }
  0x11   : > { %p411_p10 = pneg %p650_p8  ;;  %p668_p12 = scmp.eq.s32.totalorder %s67_s27, 0 }
  0x12   : > { %p77_p13 = scmp.ne.s32.totalorder %s575_s16, %s571_s15  ;;  %s464_s30 = scalar_lea.vmem %s137_s23, 16 }
  0x13   : > { %p662_p11 = pnand %p411_p10, %p811_p1  ;;  %p465_p0 = scmp.ne.s32.totalorder %s137_s23, %s464_s30 }
  0x14   : > { %p472_p9 = scmp.lt.s32.totalorder %s137_s23, %s137_s23  ;;  %p473_p2 = scmp.lt.s32.totalorder %s464_s30, %s464_s30 }
  0x15   : > { %p466_p3 = pneg %p662_p11 }
  0x16   : > { %p474_p10 = por %p473_p2, %p472_p9 }
  0x17   : > { %p467_p5 = pnand %p466_p3, %p465_p0 }
  0x19   : > { %p468_p7 = pneg %p467_p5 }
  0x1b   : > { %p475_p1 = pnand %p474_p10, %p468_p7 }
  0x1d   : > { %478 = shalt.err (!%p475_p1)
}
  0x1e   : > { %s581_s4 = smov [#allocation3]   ;;  %p78_p2 = scmp.eq.s32.totalorder %s579_s17, 0 }
  0x1f   : > { %414 = dma.vmem_to_smem (!%p662_p11), %s137_s23, 16, %s581_s4, [#allocation6]  }
  0x20   : > { %s682_s5 = scalar_select %p668_p12, %s575_s16, %s70_s29  }
  0x21   : > { %p819_p1 = scmp.eq.s32.totalorder %s628_s0, 1  ;;  %p424_p0 = scmp.lt.s32.totalorder %s579_s17, 2 }
  0x22   : > { %s147_s7 = sand.u32 1, %s575_s16   ;;  %p79_p3 = por %p78_p2, %p77_p13 }
  0x23   : > { %p690_p9 = por %p819_p1, %p77_p13  ;;  %s388_s8 = sshll.u32 %s147_s7, 3 }
  0x24   : > { %s389_s9 = sshll.u32 %s579_s17, 7  ;;  %s151_s13 = scalar_lea.vmem [#allocation7], %s388_s8 }
  0x25   : > { %s820_s6 = scalar_select %p690_p9, 1, 0 }
  0x26   : > { %s703_s12 = scalar_lea.hbm %s809_s2, %s389_s9  ;;  %s158_s18 = sshll.u32 %s151_s13, 4  ;;  %s709_s18 = int_to_ptr.vmem [resolvable:$true] %s158_s18 }
  0x27   : > { %p705_p11 = pnand %p424_p0, %p79_p3  ;;  %s148_s22 = scalar_lea.sflag [#allocation4], %s147_s7 }
  0x28   : > { %s479_s23 = scalar_lea.hbm %s703_s12, 128  ;;  %s484_s28 = scalar_lea.hbm %s809_s2, 256 }
  0x29   : > { %p480_p12 = scmp.ne.s32.totalorder %s703_s12, %s479_s23  ;;  %p481_p13 = pneg %p705_p11 }
  0x2a   : > { %p485_p10 = scmp.lt.u32.totalorder %s703_s12, %s809_s2  ;;  %p486_p2 = scmp.lt.u32.totalorder %s484_s28, %s479_s23 }
  0x2b   : > { %p482_p5 = pnand %p481_p13, %p480_p12  ;;  %p488_p0 = scmp.lt.u32.totalorder %s479_s23, %s703_s12 }
  0x2c   : > { %p487_p1 = por %p486_p2, %p485_p10 }
  0x2d   : > { %p483_p7 = pneg %p482_p5 }
  0x2e   : > { %p489_p3 = por %p488_p0, %p487_p1 }
  0x30   : > { %p490_p6 = pnand %p489_p3, %p483_p7 }
  0x32   : > { %493 = shalt.err (!%p490_p6)
}
  0x33   : > { %s494_s4 = scalar_lea.vmem %s709_s18, 128  ;;  %s582_s7 = smov [#allocation7]  }
  0x34   : > { %p495_p12 = scmp.ne.s32.totalorder %s709_s18, %s494_s4  ;;  %s499_s8 = sshll.u32 %s582_s7, 4  ;;  %s500_s8 = int_to_ptr.vmem [resolvable:$false] %s499_s8 }
  0x35   : > { %s501_s9 = scalar_lea.vmem %s500_s8, 256  ;;  %p502_p4 = scmp.lt.s32.totalorder %s709_s18, %s500_s8 }
  0x36   : > { %p497_p5 = pnand %p495_p12, %p481_p13  ;;  %p503_p10 = scmp.lt.s32.totalorder %s501_s9, %s494_s4 }
  0x38   : > { %p498_p9 = pneg %p497_p5  ;;  %p504_p2 = por %p503_p10, %p502_p4 }
  0x3a   : > { %p505_p1 = pnand %p504_p2, %p498_p9 }
  0x3c   : > { %508 = shalt.err (!%p505_p1)
}
  0x3d   : > { %418 = dma.hbm_to_vmem [thread:$0]  (!%p705_p11), %s703_s12, 128, %s709_s18, %s148_s22  }
  0x3e   : > { %167 = sbr.rel (%p650_p8) target bundleno = 209 (0xd1), region = 32  ;;  %p822_p6 = scmp.eq.s32.totalorder (!%p650_p8), %s628_s0, 0 }
  0x45   : > { %554 = dma.done.wait (%p822_p6), [#allocation6], 16   ;;  %p823_p13 = pmov %p822_p6 }
  0x46   : > { %s743_s10 = sand.u32 1, %s571_s15   ;;  %p824_p4 = scmp.ne.s32.totalorder %s814_s19, 0 }
  0x47   : > { %556 = vsyncadd (%p823_p13), [#allocation6], 4294967280  ;;  %s392_s11 = sshll.u32 %s743_s10, 3  ;;  %s174_s13 = scalar_lea.sflag [#allocation4], %s743_s10 }
  0x48   : > { %s749_s12 = scalar_lea.vmem [#allocation7], %s392_s11 }
  0x49   : > { %558 = dma.done.wait (%p824_p4), %s174_s13, 128  }
  0x4a   : > { %560 = vsyncadd (%p824_p4), %s174_s13, 4294967168 }
  0x4b   : > { %182 = sfence }
  0x4c   : > { %v203_v0 = vlaneseq  ;;  %s395_s24 = sshll.u32 %s628_s0, 10  ;;  %s212_s18 = sld [smem:[#allocation2]] }
  0x4d   : > { %v209_v2 = vstv %s395_s24  ;;  %s201_s19 = sld [smem:[#allocation3]]  ;;  %s394_s22 = sld [smem:[#allocation3 + $0x1]] }
  0x4e   : > { %v204_v1 = vshrl.u32 %v203_v0, 7  ;;  %v206_v3 = vand.u32 127, %v203_v0  ;;  %s200_s23 = scalar_lea.vmem [#allocation8], %s392_s11  ;;  %s400_s27 = sshll.u32 %s628_s0, 7 }
  0x4f   : > { %s302_s26 = sshll.u32 %s200_s23, 4  ;;  %s765_s30 = scalar_lea.hbm %s810_s3, %s400_s27  ;;  %s760_s26 = int_to_ptr.vmem [resolvable:$true] %s302_s26 }
  0x50   : > { %v208_v4 = vmul.u32 128, %v204_v1  ;;  %s289_s4 = scalar_lea.sflag [#allocation5], %s743_s10  ;;  %s509_s7 = scalar_lea.vmem %s760_s26, 128 }
  0x51   : > { %p510_p8 = scmp.ne.s32.totalorder %s760_s26, %s509_s7  ;;  %p825_p9 = scmp.ne.s32.totalorder %s820_s6, 0 }
  0x52   : > { %v210_v5 = vadd.s32 %v209_v2, %v208_v4  ;;  %s213_s21 = smul.u32 2654435769, %s212_s18  ;;  %s583_s0 = smov [#allocation8]  }
  0x53   : > { %p511_p11 = pnand %p510_p8, %p825_p9  ;;  %s513_s8 = sshll.u32 %s583_s0, 4  ;;  %s514_s8 = int_to_ptr.vmem [resolvable:$false] %s513_s8 }
  0x54   : > { %v211_v6 = vadd.s32 %v210_v5, %v206_v3  ;;  %v214_v7 = vstv %s213_s21  ;;  %s515_s9 = scalar_lea.vmem %s514_s8, 256  ;;  %p516_p0 = scmp.lt.s32.totalorder %s760_s26, %s514_s8 }
  0x55   : > { %p512_p7 = pneg %p511_p11  ;;  %p517_p3 = scmp.lt.s32.totalorder %s515_s9, %s509_s7 }
  0x56   : > { %v215_v8 = vxor.u32 %v214_v7, %v211_v6  ;;  %v282_v6 = vstv %s201_s19 }
  0x57   : > { %p518_p12 = por %p517_p3, %p516_p0 }
  0x58   : > { %v216_v9 = vshrl.u32 %v215_v8, 16 }
  0x59   : > { %p519_p5 = pnand %p518_p12, %p512_p7 }
  0x5a   : > { %v217_v10 = vxor.u32 %v216_v9, %v215_v8  ;;  %v281_v8 = vld [vmem:[%s749_s12] sm:$0xff] }
  0x5c   : > { %v218_v11 = vmul.u32 2146121005, %v217_v10  ;;  %v285_v10 = vstv %s394_s22 }
  0x5e   : > { %v219_v12 = vshrl.u32 %v218_v11, 15 }
  0x60   : > { %v220_v13 = vxor.u32 %v219_v12, %v218_v11 }
  0x62   : > { %v221_v14 = vmul.u32 2221713035, %v220_v13 }
  0x64   : > { %v222_v15 = vshrl.u32 %v221_v14, 16 }
  0x66   : > { %v223_v16 = vxor.u32 %v222_v15, %v221_v14 }
  0x68   : > { %v224_v17 = vshrl.u32 %v223_v16, 8 }
  0x6a   : > { %v225_v18 = vcvt.s32.f32 %v224_v17 }
  0x6c   : > { %v226_v19 = vadd.f32 0.5, %v225_v18 }
  0x6e   : > { %v227_v20 = vmul.f32 5.9604645e-08, %v226_v19 }
  0x70   : > { %v228_v21 = vmul.f32 2.0, %v227_v20 }
  0x72   : > { %v396_v22 = vadd.f32 -1.0, %v228_v21 }
  0x74   : > { %v230_v23 = vsub.f32 1.0, %v396_v22  ;;  %v231_v24 = vadd.f32 1.0, %v396_v22 }
  0x76   : > { %v232_v25 = vmul.f32 %v231_v24, %v230_v23 }
  0x78   : > { %460 = vlog2.f32 %v232_v25 }
  0x82   : > { %v461_v26 = vpop.eup %460 }
  0x83   : > { %v234_v27 = vmul.f32 0.6931472, %v461_v26 }
  0x85   : > { %v235_v28 = vsub.f32 0.0, %v234_v27 }
  0x87   : > { %v397_v29 = vadd.f32 -2.5, %v235_v28  ;;  %462 = vrsqrt.f32 %v235_v28  ;;  %vm255_vm0 = vcmp.eq.f32.partialorder %v235_v28, inf  ;;  %v258_v36 = vand.u32 2147483648, %v235_v28 }
  0x88   : > { %vm257_vm1 = vcmp.eq.f32.partialorder %v235_v28, 0.0  ;;  %vm277_vm2 = vcmp.lt.f32.partialorder %v235_v28, 5.0 }
  0x89   : > { %v237_v30 = vmul.f32 2.8102264e-08, %v397_v29 }
  0x8b   : > { %v238_v31 = vadd.f32 3.4327394e-07, %v237_v30 }
  0x8d   : > { %v239_v32 = vmul.f32 %v397_v29, %v238_v31 }
  0x8f   : > { %v240_v33 = vadd.f32 -3.5233877e-06, %v239_v32 }
  0x91   : > { %v463_v34 = vpop.eup %462  ;;  %v241_v35 = vmul.f32 %v397_v29, %v240_v33 }
  0x92   : > { %v254_v37 = vmul.f32 %v463_v34, %v235_v28 }
  0x93   : > { %v242_v38 = vadd.f32 -4.3915065e-06, %v241_v35 }
  0x94   : > { %v256_v39 = vsel %vm255_vm0, %v235_v28, %v254_v37 }
  0x95   : > { %v243_v40 = vmul.f32 %v397_v29, %v242_v38  ;;  %v259_v41 = vsel %vm257_vm1, %v258_v36, %v256_v39 }
  0x96   : > { %v398_v42 = vadd.f32 -3.0, %v259_v41 }
  0x97   : > { %v244_v43 = vadd.f32 0.00021858087, %v243_v40 }
  0x98   : > { %v261_v44 = vmul.f32 -0.00020021426, %v398_v42 }
  0x99   : > { %v245_v45 = vmul.f32 %v397_v29, %v244_v43 }
  0x9a   : > { %v262_v46 = vadd.f32 0.00010095056, %v261_v44 }
  0x9b   : > { %v246_v47 = vadd.f32 -0.001253725, %v245_v45 }
  0x9c   : > { %v263_v48 = vmul.f32 %v398_v42, %v262_v46 }
  0x9d   : > { %v247_v50 = vmul.f32 %v397_v29, %v246_v47 }
  0x9e   : > { %v264_v49 = vadd.f32 0.0013493432, %v263_v48 }
  0x9f   : > { %v248_v53 = vadd.f32 -0.0041776816, %v247_v50 }
  0xa0   : > { %v265_v51 = vmul.f32 %v398_v42, %v264_v49 }
  0xa1   : > { %v249_v56 = vmul.f32 %v397_v29, %v248_v53 }
  0xa2   : > { %v266_v52 = vadd.f32 -0.0036734284, %v265_v51 }
  0xa3   : > { %v250_v59 = vadd.f32 0.24664073, %v249_v56 }
  0xa4   : > { %v267_v54 = vmul.f32 %v398_v42, %v266_v52 }
  0xa5   : > { %v251_v62 = vmul.f32 %v397_v29, %v250_v59 }
  0xa6   : > { %v268_v55 = vadd.f32 0.0057395077, %v267_v54 }
  0xa7   : > { %v252_v1 = vadd.f32 1.5014094, %v251_v62 }
  0xa8   : > { %v269_v57 = vmul.f32 %v398_v42, %v268_v55 }
  0xaa   : > { %v270_v58 = vadd.f32 -0.0076224613, %v269_v57 }
  0xac   : > { %v271_v60 = vmul.f32 %v398_v42, %v270_v58 }
  0xae   : > { %v272_v61 = vadd.f32 0.0094388705, %v271_v60 }
  0xb0   : > { %v273_v63 = vmul.f32 %v398_v42, %v272_v61 }
  0xb2   : > { %v274_v0 = vadd.f32 1.001674, %v273_v63 }
  0xb4   : > { %v275_v2 = vmul.f32 %v398_v42, %v274_v0 }
  0xb6   : > { %v276_v3 = vadd.f32 2.8329768, %v275_v2 }
  0xb8   : > { %v278_v4 = vsel %vm277_vm2, %v252_v1, %v276_v3 }
  0xb9   : > { %v279_v5 = vmul.f32 %v396_v22, %v278_v4 }
  0xbb   : > { %v280_v7 = vmul.f32 1.4142135, %v279_v5 }
  0xbd   : > { %v283_v9 = vmul.f32 %v282_v6, %v280_v7 }
  0xbf   : > { %v284_v11 = vadd.f32 %v283_v9, %v281_v8 }
  0xc1   : > { %v286_v12 = vadd.f32 %v285_v10, %v284_v11 }
  0xc3   : > { %287 = vst [vmem:[%s200_s23] sm:$0xff] %v286_v12 }
  0xc4   : > { %522 = shalt.err (!%p519_p5)
}
  0xc5   : > { %s523_s10 = scalar_lea.hbm %s765_s30, 128  ;;  %s527_s12 = scalar_lea.hbm %s810_s3, 256 }
  0xc6   : > { %p524_p10 = scmp.ne.s32.totalorder %s765_s30, %s523_s10  ;;  %p528_p6 = scmp.lt.u32.totalorder %s765_s30, %s810_s3 }
  0xc7   : > { %p529_p13 = scmp.lt.u32.totalorder %s527_s12, %s523_s10  ;;  %p531_p8 = scmp.lt.u32.totalorder %s523_s10, %s765_s30 }
  0xc8   : > { %p525_p2 = pnand %p524_p10, %p825_p9 }
  0xc9   : > { %p530_p4 = por %p529_p13, %p528_p6 }
  0xca   : > { %p526_p1 = pneg %p525_p2 }
  0xcb   : > { %p532_p11 = por %p531_p8, %p530_p4 }
  0xcd   : > { %p533_p7 = pnand %p532_p11, %p526_p1 }
  0xcf   : > { %536 = shalt.err (!%p533_p7)
}
  0xd0   : > { %409 = dma.vmem_to_hbm [thread:$0]  (%p825_p9), %s760_s26, 128, %s765_s30, %s289_s4  }
  0xd1 PF: > { %s314_s21 = sand.u32 1, %s567_s14   ;;  %p826_p0 = scmp.ne.s32.totalorder %s815_s20, 0 }
  0xd2   : > { %p827_p3 = scmp.ge.s32.totalorder %s579_s17, 2  ;;  %s315_s19 = scalar_lea.sflag [#allocation5], %s314_s21 }
  0xd4   : > { %p420_p12 = pnand %p827_p3, %p826_p0 }
  0xd6   : > { %562 = dma.done.wait (!%p420_p12), %s315_s19, 128  }
  0xd7   : > { %564 = vsyncadd (!%p420_p12), %s315_s19, 4294967168  ;;  %p18_p5 = scmp.ge.s32.totalorder %s658_s25, 4   ;;  %s828_s14 = smov %s571_s15 }
  0xd8   : > { %s829_s15 = smov %s575_s16  ;;  %s830_s16 = smov %s682_s5 }
  0xd9   : > { %s831_s17 = smov %s658_s25  ;;  %20 = sbr.rel (!%p18_p5) target bundleno = 8 (0x8), region = 82 }
  0xe0   :  { %320 = vsyncpa [#allocation4], 1 }
  0xe1   :  { %322 = vsyncpa [#allocation4 + $0x1], 1 }
  0xe2   :  { %323 = vsyncpa [#allocation5], 1 }
  0xe3   :  { %325 = vsyncpa [#allocation5 + $0x1], 1 }
  0xe4   :  { %326 = vsyncpa [#allocation6], 1 }
  0xe5   :  { %328 = vsyncpa [#allocation6 + $0x1], 1 }

</bundles_post_ra>
